<compile_context>
chip_gen: v6e
topology: v6e:2x2x1
jax: 0.10.0
libtpu: 0.0.40
codegen_flags: <defaults>
</compile_context>

<pallas_src>
import functools

import jax
import jax.numpy as jnp
import numpy as np
from jax.experimental import pallas as pl
from jax.experimental.pallas import tpu as pltpu


def _ggnn_prop_kernel(a_ref, s_in_ref, s_out_ref, s_cur_ref, w_ref, b_ref, out_ref):
    BG, N, _ = a_ref.shape          # batch-chunk, n_node, 2*NE
    NE = s_in_ref.shape[1]          # n_node * n_edge_types
    D = s_cur_ref.shape[2]          # state_dim
    cdt = w_ref.dtype               # matmul compute dtype (bf16 or f32)

    W = w_ref[...]                  # (3D, 3D); columns = [r | z | h], rows = [a_in | a_out | cur]
    bias = b_ref[...].astype(jnp.float32)   # (1, 3D) = [br | bz | bh]
    w_in = W[:D]                    # (D, 3D)  -- sublane-aligned static slices
    w_out = W[D:2 * D]
    w_cur = W[2 * D:]

    # State-side projections, flattened over batch so the MXU sees (BG*NE) rows.
    sw_in = jnp.dot(s_in_ref[...].reshape(BG * NE, D), w_in,
                    preferred_element_type=jnp.float32)      # (BG*NE, 3D)
    sw_out = jnp.dot(s_out_ref[...].reshape(BG * NE, D), w_out,
                     preferred_element_type=jnp.float32)     # (BG*NE, 3D)
    # Stack along the node*edge (sublane) axis so a single batched bmm against the
    # *un-sliced* A computes  a_in @ W_in + a_out @ W_out  for all three gates.
    sw = jnp.concatenate(
        [sw_in.reshape(BG, NE, 3 * D).astype(cdt),
         sw_out.reshape(BG, NE, 3 * D).astype(cdt)], axis=1)  # (BG, 2NE, 3D)

    pre = jnp.einsum('bnm,bmf->bnf', a_ref[...], sw,
                     preferred_element_type=jnp.float32)      # (BG, N, 3D)
    pre = pre.reshape(BG * N, 3 * D)

    s_cur = s_cur_ref[...].reshape(BG * N, D).astype(jnp.float32)

    # Fused r/z gates: state_cur contribution to the [r|z] columns in one dot.
    cur_rz = jnp.dot(s_cur.astype(cdt), w_cur[:, :2 * D],
                     preferred_element_type=jnp.float32)      # (BG*N, 2D)
    rz = jax.nn.sigmoid(pre[:, :2 * D] + cur_rz + bias[:, :2 * D])
    r = rz[:, :D]
    z = rz[:, D:]

    # Candidate state: only the third chunk differs ((r*s_cur) instead of s_cur).
    h_cur = jnp.dot((r * s_cur).astype(cdt), w_cur[:, 2 * D:],
                    preferred_element_type=jnp.float32)       # (BG*N, D)
    h_hat = jnp.tanh(pre[:, 2 * D:] + h_cur + bias[:, 2 * D:])

    out = (1.0 - z) * s_cur + z * h_hat
    out_ref[...] = out.reshape(BG, N, D).astype(out_ref.dtype)


@functools.partial(jax.jit,
                   static_argnames=("n_node", "n_edge_types", "matmul_dtype", "batch_group"))
def lstm_propagator(state_in, state_out, state_cur, A, params, *, n_node, n_edge_types,
                    matmul_dtype=jnp.bfloat16, batch_group=None):
    B, N, D = state_cur.shape
    NE = n_node * n_edge_types
    assert N == n_node
    assert A.shape == (B, N, 2 * NE)

    wr_t, br, wz_t, bz, wh_t, bh = params  # wr_t etc: (3D, D); biases: (1, D)

    # Pack the three gate linears into one weight / one bias operand.
    w_packed = jnp.concatenate([wr_t, wz_t, wh_t], axis=1)    # (3D, 3D), cols [r|z|h]
    b_packed = jnp.concatenate([br, bz, bh], axis=1)          # (1, 3D), kept f32

    # Matmul operands in the compute dtype (bf16 on v6e/v7x, f32 on v5e);
    # state_cur and biases stay f32 (needed elementwise / for f32 activations).
    cd = matmul_dtype
    A_c = A.astype(cd)
    s_in_c = state_in.astype(cd)
    s_out_c = state_out.astype(cd)
    w_c = w_packed.astype(cd)

    # Fold the batch into at most 2 grid steps: amortizes per-step overhead and,
    # when B is large, still gives both v7x TensorCores a "parallel" step each.
    if batch_group is None:
        BG = B if (B < 4 or B % 2 != 0) else B // 2
    else:
        BG = batch_group
    assert B % BG == 0, "batch_group must divide the batch size"
    grid = (B // BG,)

    # NOTE: for very large graphs (n_node in the hundreds+), the (BG, N, 2NE)
    # A-block grows quadratically; add a reduction grid axis over NE with an f32
    # accumulator and set vmem_limit_bytes (v7x has only 64 MiB VMEM).
    full2d = lambda c: (0, 0)

    out = pl.pallas_call(
        _ggnn_prop_kernel,
        out_shape=jax.ShapeDtypeStruct((B, N, D), state_cur.dtype),
        grid_spec=pltpu.PrefetchScalarGridSpec(
            num_scalar_prefetch=0,
            grid=grid,
            in_specs=[
                pl.BlockSpec((BG, N, 2 * NE), lambda c: (c, 0, 0)),  # A (un-sliced)
                pl.BlockSpec((BG, NE, D), lambda c: (c, 0, 0)),      # state_in
                pl.BlockSpec((BG, NE, D), lambda c: (c, 0, 0)),      # state_out
                pl.BlockSpec((BG, N, D), lambda c: (c, 0, 0)),       # state_cur
                pl.BlockSpec((3 * D, 3 * D), full2d),                # packed W^T
                pl.BlockSpec((1, 3 * D), full2d),                    # packed bias
            ],
            out_specs=pl.BlockSpec((BG, N, D), lambda c: (c, 0, 0)),
        ),
        compiler_params=pltpu.CompilerParams(
            dimension_semantics=("parallel",)),
    )(A_c, s_in_c, s_out_c, state_cur, w_c, b_packed)
    return out


def init_params(key, state_dim):
    """Deterministic nn.Linear-style init: U(-1/sqrt(fan_in), 1/sqrt(fan_in))."""
    D = state_dim
    fan_in = 3 * D
    bound = 1.0 / np.sqrt(fan_in)
    keys = jax.random.split(key, 6)

    def lin(kw, kb):
        w = jax.random.uniform(kw, (D, 3 * D), jnp.float32, -bound, bound)  # torch layout
        b = jax.random.uniform(kb, (D,), jnp.float32, -bound, bound)
        return w.T, b.reshape(1, D)  # pre-transpose for y = x @ W^T + b

    wr_t, br = lin(keys[0], keys[1])
    wz_t, bz = lin(keys[2], keys[3])
    wh_t, bh = lin(keys[4], keys[5])
    return (wr_t, br, wz_t, bz, wh_t, bh)


def reference_forward(state_in, state_out, state_cur, A, params, n_node, n_edge_types):
    """Pure-JAX f32 reference mirroring the PyTorch forward."""
    NE = n_node * n_edge_types
    wr_t, br, wz_t, bz, wh_t, bh = params
    A_in = A[:, :, :NE]
    A_out = A[:, :, NE:]
    a_in = jnp.einsum("bnm,bmd->bnd", A_in, state_in)
    a_out = jnp.einsum("bnm,bmd->bnd", A_out, state_out)
    a = jnp.concatenate([a_in, a_out, state_cur], axis=2)
    r = jax.nn.sigmoid(a @ wr_t + br)
    z = jax.nn.sigmoid(a @ wz_t + bz)
    joined = jnp.concatenate([a_in, a_out, r * state_cur], axis=2)
    h_hat = jnp.tanh(joined @ wh_t + bh)
    return (1.0 - z) * state_cur + z * h_hat


if __name__ == "__main__":
    # Small shapes consistent with the module.
    B = 2
    state_dim = 32
    n_node = 16
    n_edge_types = 2
    NE = n_node * n_edge_types

    key = jax.random.PRNGKey(0)
    k1, k2, k3, k4, kp = jax.random.split(key, 5)

    state_in = jax.random.normal(k1, (B, NE, state_dim), jnp.float32)
    state_out = jax.random.normal(k2, (B, NE, state_dim), jnp.float32)
    state_cur = jax.random.normal(k3, (B, n_node, state_dim), jnp.float32)
    A = jax.random.normal(k4, (B, n_node, 2 * NE), jnp.float32)

    params = init_params(kp, state_dim)

    ref = reference_forward(state_in, state_out, state_cur, A, params,
                            n_node, n_edge_types)

    # f32 matmul path (v5e-style): tight correctness check.
    out_f32 = lstm_propagator(state_in, state_out, state_cur, A, params,
                              n_node=n_node, n_edge_types=n_edge_types,
                              matmul_dtype=jnp.float32)
    out_f32 = jax.block_until_ready(out_f32)
    np.testing.assert_allclose(np.asarray(out_f32), np.asarray(ref),
                               rtol=1e-4, atol=1e-4)

    # Default bf16 matmul path (native MXU on v6e/v7x): looser tolerance.
    out_bf16 = lstm_propagator(state_in, state_out, state_cur, A, params,
                               n_node=n_node, n_edge_types=n_edge_types)
    out_bf16 = jax.block_until_ready(out_bf16)
    np.testing.assert_allclose(np.asarray(out_bf16), np.asarray(ref),
                               rtol=5e-2, atol=5e-2)

    print("KERNEL_OK")
</pallas_src>

<mosaic_0001>
module attributes {stable_mosaic.version = 11 : i64} {
  func.func @_ggnn_prop_kernel(%arg0: i32, %arg1: memref<2x16x64xf32, #tpu.memory_space<vmem>>, %arg2: memref<2x32x32xf32, #tpu.memory_space<vmem>>, %arg3: memref<2x32x32xf32, #tpu.memory_space<vmem>>, %arg4: memref<2x16x32xf32, #tpu.memory_space<vmem>>, %arg5: memref<96x96xf32, #tpu.memory_space<vmem>>, %arg6: memref<1x96xf32, #tpu.memory_space<vmem>>, %arg7: memref<2x16x32xf32, #tpu.memory_space<vmem>>) attributes {dimension_semantics = [#tpu.dimension_semantics<parallel>], iteration_bounds = array<i64: 1>, scalar_prefetch = 0 : i64, scratch_operands = 0 : i64, tpu.core_type = #tpu.core_type<tc>, window_params = [{transform_indices = @transform_0, window_bounds = array<i64: 2, 16, 64>}, {transform_indices = @transform_1, window_bounds = array<i64: 2, 32, 32>}, {transform_indices = @transform_2, window_bounds = array<i64: 2, 32, 32>}, {transform_indices = @transform_3, window_bounds = array<i64: 2, 16, 32>}, {pipeline_mode = #tpu.pipeline_mode<synchronous>, transform_indices = @transform_4, window_bounds = array<i64: 96, 96>}, {pipeline_mode = #tpu.pipeline_mode<synchronous>, transform_indices = @transform_5, window_bounds = array<i64: 1, 96>}, {transform_indices = @transform_6, window_bounds = array<i64: 2, 16, 32>}]} {
    %c0 = arith.constant 0 : index
    %c0_0 = arith.constant 0 : index
    %0 = vector.load %arg5[%c0, %c0_0] : memref<96x96xf32, #tpu.memory_space<vmem>>, vector<96x96xf32>
    %c0_1 = arith.constant 0 : index
    %c0_2 = arith.constant 0 : index
    %1 = vector.load %arg6[%c0_1, %c0_2] : memref<1x96xf32, #tpu.memory_space<vmem>>, vector<1x96xf32>
    %2 = vector.extract_strided_slice %0 {offsets = [0, 0], sizes = [32, 96], strides = [1, 1]} : vector<96x96xf32> to vector<32x96xf32>
    %3 = vector.extract_strided_slice %0 {offsets = [32, 0], sizes = [32, 96], strides = [1, 1]} : vector<96x96xf32> to vector<32x96xf32>
    %4 = vector.extract_strided_slice %0 {offsets = [64, 0], sizes = [32, 96], strides = [1, 1]} : vector<96x96xf32> to vector<32x96xf32>
    %c0_3 = arith.constant 0 : index
    %c0_4 = arith.constant 0 : index
    %c0_5 = arith.constant 0 : index
    %5 = vector.load %arg2[%c0_3, %c0_4, %c0_5] : memref<2x32x32xf32, #tpu.memory_space<vmem>>, vector<2x32x32xf32>
    %6 = vector.shape_cast %5 : vector<2x32x32xf32> to vector<64x32xf32>
    %cst = arith.constant dense<0.000000e+00> : vector<64x96xf32>
    %7 = tpu.matmul %6, %2, %cst {dimension_numbers = #tpu.dot_dimension_numbers<[1], [0], [0], [1], [0, 0, 1, 1], [], []>} : vector<64x32xf32>, vector<32x96xf32>, vector<64x96xf32> -> vector<64x96xf32>
    %c0_6 = arith.constant 0 : index
    %c0_7 = arith.constant 0 : index
    %c0_8 = arith.constant 0 : index
    %8 = vector.load %arg3[%c0_6, %c0_7, %c0_8] : memref<2x32x32xf32, #tpu.memory_space<vmem>>, vector<2x32x32xf32>
    %9 = vector.shape_cast %8 : vector<2x32x32xf32> to vector<64x32xf32>
    %cst_9 = arith.constant dense<0.000000e+00> : vector<64x96xf32>
    %10 = tpu.matmul %9, %3, %cst_9 {dimension_numbers = #tpu.dot_dimension_numbers<[1], [0], [0], [1], [0, 0, 1, 1], [], []>} : vector<64x32xf32>, vector<32x96xf32>, vector<64x96xf32> -> vector<64x96xf32>
    %11 = vector.shape_cast %7 : vector<64x96xf32> to vector<2x32x96xf32>
    %12 = vector.shape_cast %10 : vector<64x96xf32> to vector<2x32x96xf32>
    %13 = tpu.concatenate %11, %12 in 1 : vector<2x32x96xf32>, vector<2x32x96xf32> -> vector<2x64x96xf32>
    %c0_10 = arith.constant 0 : index
    %c0_11 = arith.constant 0 : index
    %c0_12 = arith.constant 0 : index
    %14 = vector.load %arg1[%c0_10, %c0_11, %c0_12] : memref<2x16x64xf32, #tpu.memory_space<vmem>>, vector<2x16x64xf32>
    "tpu.trace_start"() <{level = 10 : i32, message = "bnm,bmf->bnf"}> : () -> ()
    %cst_13 = arith.constant dense<0.000000e+00> : vector<2x16x96xf32>
    %15 = tpu.matmul %14, %13, %cst_13 {dimension_numbers = #tpu.dot_dimension_numbers<[2], [1], [1], [2], [0, 0, 0, 1, 1, 2], [0], [0]>} : vector<2x16x64xf32>, vector<2x64x96xf32>, vector<2x16x96xf32> -> vector<2x16x96xf32>
    "tpu.trace_stop"() : () -> ()
    %16 = vector.shape_cast %15 : vector<2x16x96xf32> to vector<32x96xf32>
    %c0_14 = arith.constant 0 : index
    %c0_15 = arith.constant 0 : index
    %c0_16 = arith.constant 0 : index
    %17 = vector.load %arg4[%c0_14, %c0_15, %c0_16] : memref<2x16x32xf32, #tpu.memory_space<vmem>>, vector<2x16x32xf32>
    %18 = vector.shape_cast %17 : vector<2x16x32xf32> to vector<32x32xf32>
    %19 = vector.extract_strided_slice %4 {offsets = [0, 0], sizes = [32, 64], strides = [1, 1]} : vector<32x96xf32> to vector<32x64xf32>
    %cst_17 = arith.constant dense<0.000000e+00> : vector<32x64xf32>
    %20 = tpu.matmul %18, %19, %cst_17 {dimension_numbers = #tpu.dot_dimension_numbers<[1], [0], [0], [1], [0, 0, 1, 1], [], []>} : vector<32x32xf32>, vector<32x64xf32>, vector<32x64xf32> -> vector<32x64xf32>
    %21 = vector.extract_strided_slice %16 {offsets = [0, 0], sizes = [32, 64], strides = [1, 1]} : vector<32x96xf32> to vector<32x64xf32>
    %22 = arith.addf %21, %20 : vector<32x64xf32>
    %23 = vector.extract_strided_slice %1 {offsets = [0, 0], sizes = [1, 64], strides = [1, 1]} : vector<1x96xf32> to vector<1x64xf32>
    %24 = vector.broadcast %23 : vector<1x64xf32> to vector<32x64xf32>
    %25 = arith.addf %22, %24 : vector<32x64xf32>
    %26 = arith.negf %25 : vector<32x64xf32>
    %27 = math.exp %26 : vector<32x64xf32>
    %cst_18 = arith.constant 1.000000e+00 : f32
    %28 = vector.broadcast %cst_18 : f32 to vector<32x64xf32>
    %29 = arith.addf %28, %27 : vector<32x64xf32>
    %30 = arith.divf %28, %29 : vector<32x64xf32>
    %31 = vector.extract_strided_slice %30 {offsets = [0, 0], sizes = [32, 32], strides = [1, 1]} : vector<32x64xf32> to vector<32x32xf32>
    %32 = vector.extract_strided_slice %30 {offsets = [0, 32], sizes = [32, 32], strides = [1, 1]} : vector<32x64xf32> to vector<32x32xf32>
    %33 = arith.mulf %31, %18 : vector<32x32xf32>
    %34 = vector.extract_strided_slice %4 {offsets = [0, 64], sizes = [32, 32], strides = [1, 1]} : vector<32x96xf32> to vector<32x32xf32>
    %cst_19 = arith.constant dense<0.000000e+00> : vector<32x32xf32>
    %35 = tpu.matmul %33, %34, %cst_19 {dimension_numbers = #tpu.dot_dimension_numbers<[1], [0], [0], [1], [0, 0, 1, 1], [], []>} : vector<32x32xf32>, vector<32x32xf32>, vector<32x32xf32> -> vector<32x32xf32>
    %36 = vector.extract_strided_slice %16 {offsets = [0, 64], sizes = [32, 32], strides = [1, 1]} : vector<32x96xf32> to vector<32x32xf32>
    %37 = arith.addf %36, %35 : vector<32x32xf32>
    %38 = vector.extract_strided_slice %1 {offsets = [0, 64], sizes = [1, 32], strides = [1, 1]} : vector<1x96xf32> to vector<1x32xf32>
    %39 = vector.broadcast %38 : vector<1x32xf32> to vector<32x32xf32>
    %40 = arith.addf %37, %39 : vector<32x32xf32>
    %41 = math.tanh %40 : vector<32x32xf32>
    %cst_20 = arith.constant 1.000000e+00 : f32
    %42 = vector.broadcast %cst_20 : f32 to vector<32x32xf32>
    %43 = arith.subf %42, %32 : vector<32x32xf32>
    %44 = arith.mulf %43, %18 : vector<32x32xf32>
    %45 = arith.mulf %32, %41 : vector<32x32xf32>
    %46 = arith.addf %44, %45 : vector<32x32xf32>
    %47 = vector.shape_cast %46 : vector<32x32xf32> to vector<2x16x32xf32>
    %c0_21 = arith.constant 0 : index
    %c0_22 = arith.constant 0 : index
    %c0_23 = arith.constant 0 : index
    %48 = vector.load %arg7[%c0_21, %c0_22, %c0_23] : memref<2x16x32xf32, #tpu.memory_space<vmem>>, vector<2x16x32xf32>
    tpu.vector_store %arg7[%c0_21, %c0_22, %c0_23], %47 {strides = array<i32>} : memref<2x16x32xf32, #tpu.memory_space<vmem>>, vector<2x16x32xf32>,
    return
  }
  func.func @transform_0(%arg0: i32) -> (i32, i32, i32) {
    %c0_i32 = arith.constant 0 : i32
    %c0_i32_0 = arith.constant 0 : i32
    %c0_i32_1 = arith.constant 0 : i32
    return %arg0, %c0_i32, %c0_i32_0 : i32, i32, i32
  }
  func.func @transform_1(%arg0: i32) -> (i32, i32, i32) {
    %c0_i32 = arith.constant 0 : i32
    %c0_i32_0 = arith.constant 0 : i32
    %c0_i32_1 = arith.constant 0 : i32
    return %arg0, %c0_i32, %c0_i32_0 : i32, i32, i32
  }
  func.func @transform_2(%arg0: i32) -> (i32, i32, i32) {
    %c0_i32 = arith.constant 0 : i32
    %c0_i32_0 = arith.constant 0 : i32
    %c0_i32_1 = arith.constant 0 : i32
    return %arg0, %c0_i32, %c0_i32_0 : i32, i32, i32
  }
  func.func @transform_3(%arg0: i32) -> (i32, i32, i32) {
    %c0_i32 = arith.constant 0 : i32
    %c0_i32_0 = arith.constant 0 : i32
    %c0_i32_1 = arith.constant 0 : i32
    return %arg0, %c0_i32, %c0_i32_0 : i32, i32, i32
  }
  func.func @transform_4(%arg0: i32) -> (i32, i32) {
    %c0_i32 = arith.constant 0 : i32
    %c0_i32_0 = arith.constant 0 : i32
    %c0_i32_1 = arith.constant 0 : i32
    return %c0_i32, %c0_i32_0 : i32, i32
  }
  func.func @transform_5(%arg0: i32) -> (i32, i32) {
    %c0_i32 = arith.constant 0 : i32
    %c0_i32_0 = arith.constant 0 : i32
    %c0_i32_1 = arith.constant 0 : i32
    return %c0_i32, %c0_i32_0 : i32, i32
  }
  func.func @transform_6(%arg0: i32) -> (i32, i32, i32) {
    %c0_i32 = arith.constant 0 : i32
    %c0_i32_0 = arith.constant 0 : i32
    %c0_i32_1 = arith.constant 0 : i32
    return %arg0, %c0_i32, %c0_i32_0 : i32, i32, i32
  }
}

</mosaic_0001>

<bundles_post_ra>
// kernel: lstm_propagator.1
= control target key start
LH: loop header
LB: loop body
LE: loop exit
PB: predicated region body
PF: predicated region fallthrough
CT: control target
= control target key end

     0   :  { %vm45_vm0 = vcmask 261120   ;;  %s1354_s0 = inlined_call_operand.vmem [shape: f32[2,16,64], index: 0, kind: input, shape index: {}]   ;;  %s1355_s1 = inlined_call_operand.vmem [shape: f32[2,32,32], index: 1, kind: input, shape index: {}]   ;;  %s1356_s2 = inlined_call_operand.vmem [shape: f32[2,32,32], index: 2, kind: input, shape index: {}]   ;;  %s1357_s3 = inlined_call_operand.vmem [shape: f32[2,16,32], index: 3, kind: input, shape index: {}]   ;;  %s1358_s4 = inlined_call_operand.vmem [shape: f32[96,96], index: 4, kind: input, shape index: {}]   ;;  %s1359_s5 = inlined_call_operand.vmem [shape: f32[1,96], index: 5, kind: input, shape index: {}]   ;;  %s1360_s6 = inlined_call_operand.hbm [shape: f32[2,16,32], index: 6, kind: output, shape index: {}]  }
   0x1   :  { %v31_v0 = vld [vmem:[%s1358_s4 + $0x38] sm:$0xff]  ;;  %v30_v1 = vld [vmem:[%s1358_s4 + $0x30] sm:$0xff]  ;;  %v175_v3 = vld [vmem:[%s1356_s2] sm:$0xff] }
   0x2   :  { %956 = vmatprep.subr.mxu1 %v31_v0  ;;  %v27_v2 = vld [vmem:[%s1358_s4 + $0x18] sm:$0xff]  ;;  %v29_v4 = vld [vmem:[%s1358_s4 + $0x28] sm:$0xff]  ;;  %v26_v5 = vld [vmem:[%s1358_s4 + $0x10] sm:$0xff]  ;;  %964 = vmatprep.mubr.msk.f32.mxu1 %vm45_vm0, %v175_v3 }
   0x3   :  { %957 = vmatpush3.msra.mxu1 %v31_v0  ;;  %936 = vmatprep.subr.mxu0 %v27_v2  ;;  %v28_v6 = vld [vmem:[%s1358_s4 + $0x20] sm:$0xff]  ;;  %v25_v7 = vld [vmem:[%s1358_s4 + $0x8] sm:$0xff]  ;;  %v177_v10 = vld [vmem:[%s1356_s2 + $0x10] sm:$0xff] }
   0x4   :  { %958 = vmatprep.subr.mxu1 %v30_v1  ;;  %937 = vmatpush3.msra.mxu0 %v27_v2  ;;  %v176_v8 = vld [vmem:[%s1356_s2 + $0x8] sm:$0xff]  ;;  %v24_v9 = vld [vmem:[%s1358_s4] sm:$0xff] }
   0x5   :  { %959 = vmatpush3.msra.mxu1 %v30_v1  ;;  %938 = vmatprep.subr.mxu0 %v26_v5  ;;  %v37_v11 = vld [vmem:[%s1355_s1] sm:$0xff] }
   0x6   :  { %960 = vmatprep.subr.mxu1 %v29_v4  ;;  %939 = vmatpush3.msra.mxu0 %v26_v5 }
   0x7   :  { %961 = vmatpush3.msra.mxu1 %v29_v4  ;;  %940 = vmatprep.subr.mxu0 %v25_v7 }
   0x8   :  { %962 = vmatprep.subr.mxu1 %v28_v6  ;;  %941 = vmatpush3.msra.mxu0 %v25_v7 }
   0x9   :  { %963 = vmatpush3.msra.mxu1 %v28_v6 }
   0xa   :  { %11 = vsyncpa [#allocation3], 0  ;;  %965 = vmatmul.mubr.msk.f32.vlgmr.msra.gmra.mxu1 %vm45_vm0, %v176_v8  ;;  %942 = vmatprep.subr.mxu0 %v24_v9  ;;  %v38_v12 = vld [vmem:[%s1355_s1 + $0x8] sm:$0xff]  ;;  %v178_v13 = vld [vmem:[%s1356_s2 + $0x18] sm:$0xff]  ;;  %vm316_vm1 = vcmask 523264   ;;  %s1094_s27 = smov 64  }
   0xb   :  { %967 = vmatprep.mubr.msk.f32.mxu1 %vm45_vm0, %v177_v10  ;;  %943 = vmatpush3.msra.mxu0 %v24_v9  ;;  %v39_v14 = vld [vmem:[%s1355_s1 + $0x10] sm:$0xff]  ;;  %v179_v15 = vld [vmem:[%s1356_s2 + $0x20] sm:$0xff]  ;;  %v40_v16 = vld [vmem:[%s1355_s1 + $0x18] sm:$0xff]  ;;  %s1096_s19 = smov 96   ;;  %s1097_s20 = smov [#allocation2]  }
   0xc   :  { %944 = vmatprep.mubr.msk.f32.mxu0 %vm45_vm0, %v37_v11  ;;  %v180_v17 = vld [vmem:[%s1356_s2 + $0x28] sm:$0xff]  ;;  %v41_v18 = vld [vmem:[%s1355_s1 + $0x20] sm:$0xff]  ;;  %v181_v19 = vld [vmem:[%s1356_s2 + $0x30] sm:$0xff]  ;;  %s832_s21 = sshll.u32 %s1097_s20, 4  ;;  %s833_s21 = int_to_ptr.vmem [resolvable:$true] %s832_s21 }
   0xd   :  { %945 = vmatmul.mubr.msk.f32.vlgmr.msra.gmra.mxu0 %vm45_vm0, %v38_v12  ;;  %v42_v20 = vld [vmem:[%s1355_s1 + $0x28] sm:$0xff]  ;;  %v182_v21 = vld [vmem:[%s1356_s2 + $0x38] sm:$0xff]  ;;  %v43_v22 = vld [vmem:[%s1355_s1 + $0x30] sm:$0xff]  ;;  %s1072_s22 = scalar_lea.vmem %s833_s21, 512  ;;  %p1077_p1 = scmp.lt.s32.totalorder %s833_s21, %s833_s21 }
   0xe   :  { %968 = vmatmul.mubr.msk.f32.gmra.mxu1 %vm45_vm0, %v178_v13  ;;  %947 = vmatprep.mubr.msk.f32.mxu0 %vm45_vm0, %v39_v14  ;;  %v44_v23 = vld [vmem:[%s1355_s1 + $0x38] sm:$0xff]  ;;  %v312_v24 = vld [vmem:[%s1354_s0] sm:$0xff]  ;;  %v314_v25 = vld [vmem:[%s1354_s0 + $0x10] sm:$0xff]  ;;  %p1073_p0 = scmp.ne.s32.totalorder %s833_s21, %s1072_s22  ;;  %p1078_p2 = scmp.lt.s32.totalorder %s1072_s22, %s1072_s22 }
   0xf   :  { %970 = vmatprep.mubr.msk.f32.mxu1 %vm45_vm0, %v179_v15  ;;  %v35_v26 = vld [vmem:[%s1358_s4 + $0x58] sm:$0xff]  ;;  %v33_v27 = vld [vmem:[%s1358_s4 + $0x48] sm:$0xff]  ;;  %v34_v28 = vld [vmem:[%s1358_s4 + $0x50] sm:$0xff] }
  0x10   :  { %632 = vrot.lane.b32.xlu0 %v35_v26, %s1094_s27  ;;  %628 = vrot.lane.b32.xlu1 %v33_v27, %s1094_s27  ;;  %v1245_v29 = vld [vmem:[%s1358_s4 + $0x40] sm:$0xff]  ;;  %v313_v45 = vld [vmem:[%s1354_s0 + $0x8] sm:$0xff]  ;;  %p1079_p3 = por %p1078_p2, %p1077_p1 }
  0x11   :  { %948 = vmatmul.mubr.msk.f32.gmra.mxu0 %vm45_vm0, %v40_v16  ;;  %v1257_v47 = vld [vmem:[%s1357_s3] sm:$0xff]  ;;  %v1262_v48 = vld [vmem:[%s1357_s3 + $0x8] sm:$0xff]  ;;  %v315_v49 = vld [vmem:[%s1354_s0 + $0x18] sm:$0xff] }
  0x12   :  { %971 = vmatmul.mubr.msk.f32.gmra.mxu1 %vm45_vm0, %v180_v17  ;;  %950 = vmatprep.mubr.msk.f32.mxu0 %vm45_vm0, %v41_v18  ;;  %v1271_v50 = vld [vmem:[%s1357_s3 + $0x10] sm:$0xff]  ;;  %v1284_v51 = vld [vmem:[%s1357_s3 + $0x18] sm:$0xff]  ;;  %v1295_v58 = vld [vmem:[%s1359_s5] ss:$0 sm:$0xff]  ;;  %s1095_s5 = smov 32   ;;  %p1080_p4 = pnand %p1079_p3, %p1073_p0 }
  0x13   :  { %973 = vmatprep.mubr.msk.f32.mxu1 %vm45_vm0, %v181_v19 }
  0x14   :  { %630 = vrot.lane.b32.xlu0 %v34_v28, %s1094_s27  ;;  %626 = vrot.lane.b32.xlu1 %v1245_v29, %s1094_s27 }
  0x15   :  { %951 = vmatmul.mubr.msk.f32.gmra.mxu0 %vm45_vm0, %v42_v20 }
  0x16   :  { %974 = vmatmul.mubr.msk.f32.gmra.mxu1 %vm45_vm0, %v182_v21  ;;  %953 = vmatprep.mubr.msk.f32.mxu0 %vm45_vm0, %v43_v22 }
  0x17   :  { %1011 = vmatprep.mubr.msk.f32.mxu1 %vm316_vm1, %v314_v25 }
  0x19   :  { %954 = vmatmul.mubr.msk.f32.gmra.mxu0 %vm45_vm0, %v44_v23 }
  0x1a   :  { %992 = vmatprep.mubr.msk.f32.mxu0 %vm316_vm1, %v312_v24 }
  0x82   :  { %v633_v52 = vpop.permute.xlu0 %632  ;;  %v629_v53 = vpop.permute.xlu1 %628 }
  0x86   :  { %v631_v54 = vpop.permute.xlu0 %630  ;;  %v627_v55 = vpop.permute.xlu1 %626 }
  0xca   :  { %v966_v30 = vpop.f32.mrf.mxu1 }
  0xcc   :  { %v273_v31 = vpop.f32.mrf.mxu1 }
  0xcd   :  { %v946_v32 = vpop.f32.mrf.mxu0 }
  0xce   :  { %v969_v33 = vpop.f32.mrf.mxu1 }
  0xcf   :  { %976 = vmatprep.subr.mxu0 %v969_v33  ;;  %v136_v34 = vpop.f32.mrf.mxu0 }
  0xd0   :  { %v283_v35 = vpop.f32.mrf.mxu1  ;;  %977 = vmatpush3.msra.mxu0 %v969_v33 }
  0xd1   :  { %978 = vmatprep.subr.mxu0 %v283_v35  ;;  %v949_v36 = vpop.f32.mrf.mxu0 }
  0xd2   :  { %v972_v37 = vpop.f32.mrf.mxu1  ;;  %979 = vmatpush3.msra.mxu0 %v283_v35 }
  0xd3   :  { %980 = vmatprep.subr.mxu0 %v966_v30  ;;  %v146_v38 = vpop.f32.mrf.mxu0 }
  0xd4   :  { %v293_v39 = vpop.f32.mrf.mxu1  ;;  %981 = vmatpush3.msra.mxu0 %v966_v30 }
  0xd5   :  { %982 = vmatprep.subr.mxu0 %v273_v31  ;;  %v952_v40 = vpop.f32.mrf.mxu0 }
  0xd6   :  { %v975_v41 = vpop.f32.mrf.mxu1  ;;  %983 = vmatpush3.msra.mxu0 %v273_v31 }
  0xd7   :  { %984 = vmatprep.subr.mxu0 %v949_v36  ;;  %995 = vmatprep.subr.mxu1 %v975_v41  ;;  %v156_v42 = vpop.f32.mrf.mxu0 }
  0xd8   :  { %v303_v43 = vpop.f32.mrf.mxu1  ;;  %985 = vmatpush3.msra.mxu0 %v949_v36  ;;  %996 = vmatpush3.msra.mxu1 %v975_v41 }
  0xd9   :  { %986 = vmatprep.subr.mxu0 %v146_v38  ;;  %997 = vmatprep.subr.mxu1 %v303_v43  ;;  %v955_v44 = vpop.f32.mrf.mxu0 }
  0xda   :  { %987 = vmatpush3.msra.mxu0 %v146_v38  ;;  %998 = vmatpush3.msra.mxu1 %v303_v43 }
  0xdb   :  { %988 = vmatprep.subr.mxu0 %v946_v32  ;;  %999 = vmatprep.subr.mxu1 %v972_v37  ;;  %v166_v46 = vpop.f32.mrf.mxu0 }
  0xdc   :  { %989 = vmatpush3.msra.mxu0 %v946_v32  ;;  %1000 = vmatpush3.msra.mxu1 %v972_v37 }
  0xdd   :  { %990 = vmatprep.subr.mxu0 %v136_v34  ;;  %1001 = vmatprep.subr.mxu1 %v293_v39 }
  0xde   :  { %991 = vmatpush3.msra.mxu0 %v136_v34  ;;  %1002 = vmatpush3.msra.mxu1 %v293_v39 }
  0xdf   :  { %993 = vmatmul.mubr.msk.f32.vlgmr.msra.gmra.mxu0 %vm316_vm1, %v313_v45  ;;  %1003 = vmatprep.subr.mxu1 %v955_v44 }
  0xe0   :  { %1014 = vmatprep.subr.mxu0 %v35_v26  ;;  %1004 = vmatpush3.msra.mxu1 %v955_v44 }
  0xe1   :  { %1015 = vmatpush3.msra.mxu0 %v35_v26  ;;  %1005 = vmatprep.subr.mxu1 %v166_v46 }
  0xe2   :  { %1016 = vmatprep.subr.mxu0 %v34_v28  ;;  %1006 = vmatpush3.msra.mxu1 %v166_v46 }
  0xe3   :  { %1017 = vmatpush3.msra.mxu0 %v34_v28  ;;  %1007 = vmatprep.subr.mxu1 %v952_v40 }
  0xe4   :  { %1018 = vmatprep.subr.mxu0 %v33_v27  ;;  %1008 = vmatpush3.msra.mxu1 %v952_v40 }
  0xe5   :  { %1019 = vmatpush3.msra.mxu0 %v33_v27  ;;  %1009 = vmatprep.subr.mxu1 %v156_v42 }
  0xe6   :  { %1020 = vmatprep.subr.mxu0 %v1245_v29  ;;  %1010 = vmatpush3.msra.mxu1 %v156_v42 }
  0xe7   :  { %1021 = vmatpush3.msra.mxu0 %v1245_v29  ;;  %1022 = vmatprep.mubr.msk.f32.mxu0 %vm45_vm0, %v1257_v47 }
  0xe8   :  { %1023 = vmatmul.mubr.msk.f32.vlgmr.msra.gmra.mxu0 %vm45_vm0, %v1262_v48  ;;  %1012 = vmatmul.mubr.msk.f32.vlgmr.msra.gmra.mxu1 %vm316_vm1, %v315_v49 }
  0xe9   :  { %1025 = vmatprep.mubr.msk.f32.mxu0 %vm45_vm0, %v1271_v50  ;;  %1028 = vmatprep.subr.mxu1 %v633_v52 }
  0xea   :  { %1029 = vmatpush3.msra.mxu1 %v633_v52 }
  0xeb   :  { %1030 = vmatprep.subr.mxu1 %v631_v54 }
  0xec   :  { %1026 = vmatmul.mubr.msk.f32.gmra.mxu0 %vm45_vm0, %v1284_v51  ;;  %1031 = vmatpush3.msra.mxu1 %v631_v54 }
  0xed   :  { %1032 = vmatprep.subr.mxu1 %v629_v53 }
  0xee   :  { %1033 = vmatpush3.msra.mxu1 %v629_v53 }
  0xef   :  { %1034 = vmatprep.subr.mxu1 %v627_v55 }
  0xf0   :  { %1035 = vmatpush3.msra.mxu1 %v627_v55 }
 0x19f   :  { %v1288_v56 = vpop.f32.mrf.mxu0 }
 0x1a1   :  { %v1290_v57 = vpop.f32.mrf.mxu0 }
 0x1a8   :  { %v1024_v59 = vpop.f32.mrf.mxu0  ;;  %v1298_v61 = vpop.f32.mrf.mxu1 }
 0x1a9   :  { %v581_v60 = vadd.f32 %v1024_v59, %v1288_v56 }
 0x1aa   :  { %v561_v62 = vpop.f32.mrf.mxu0  ;;  %v470_v5 = vpop.f32.mrf.mxu1 }
 0x1ab   :  { %v591_v63 = vadd.f32 %v1295_v58, %v581_v60  ;;  %v580_v0 = vadd.f32 %v561_v62, %v1290_v57 }
 0x1ac   :  { %v1027_v1 = vpop.f32.mrf.mxu0 }
 0x1ad   :  { %v869_v2 = vmul.f32 -1.442695, %v591_v63  ;;  %v590_v3 = vadd.f32 %v1295_v58, %v580_v0  ;;  %v583_v4 = vadd.f32 %v1027_v1, %v1298_v61 }
 0x1ae   :  { %v571_v6 = vpop.f32.mrf.mxu0 }
 0x1af   :  { %1048 = vpow2.f32 %v869_v2  ;;  %v868_v7 = vmul.f32 -1.442695, %v590_v3  ;;  %v593_v8 = vadd.f32 %v1295_v58, %v583_v4  ;;  %v582_v9 = vadd.f32 %v571_v6, %v470_v5 }
 0x1b1   :  { %1050 = vpow2.f32 %v868_v7  ;;  %v871_v10 = vmul.f32 -1.442695, %v593_v8  ;;  %v592_v11 = vadd.f32 %v1295_v58, %v582_v9 }
 0x1b3   :  { %1052 = vpow2.f32 %v871_v10  ;;  %v870_v12 = vmul.f32 -1.442695, %v592_v11 }
 0x1b5   :  { %1054 = vpow2.f32 %v870_v12 }
 0x1bc   :  { %v1049_v13 = vpop.eup %1048 }
 0x1bd   :  { %v607_v14 = vadd.f32 1.0, %v1049_v13 }
 0x1be   :  { %v1051_v15 = vpop.eup %1050 }
 0x1bf   :  { %v606_v16 = vadd.f32 1.0, %v1051_v15  ;;  %1056 = vrcp.f32 %v607_v14 }
 0x1c0   :  { %v1053_v17 = vpop.eup %1052 }
 0x1c1   :  { %1058 = vrcp.f32 %v606_v16  ;;  %v609_v18 = vadd.f32 1.0, %v1053_v17 }
 0x1c2   :  { %v1055_v19 = vpop.eup %1054 }
 0x1c3   :  { %v608_v20 = vadd.f32 1.0, %v1055_v19  ;;  %1060 = vrcp.f32 %v609_v18 }
 0x1c5   :  { %1062 = vrcp.f32 %v608_v20 }
 0x1cc   :  { %v1057_v21 = vpop.eup %1056 }
 0x1cd   :  { %v619_v24 = vmul.f32 %v1057_v21, %v1262_v48  ;;  %v764_v53 = vsub.f32 1.0, %v1057_v21 }
 0x1ce   :  { %v1059_v22 = vpop.eup %1058 }
 0x1cf   :  { %v618_v23 = vmul.f32 %v1059_v22, %v1257_v47 }
 0x1d0   :  { %v1308_v25 = vpop.eup %1060 }
 0x1d1   :  { %1036 = vmatprep.mubr.msk.f32.mxu1 %vm45_vm0, %v618_v23  ;;  %v621_v28 = vmul.f32 %v1308_v25, %v1284_v51  ;;  %v766_v60 = vsub.f32 1.0, %v1308_v25 }
 0x1d2   :  { %v1311_v26 = vpop.eup %1062  ;;  %1037 = vmatmul.mubr.msk.f32.vlgmr.msra.gmra.mxu1 %vm45_vm0, %v619_v24 }
 0x1d3   :  { %v620_v27 = vmul.f32 %v1311_v26, %v1271_v50  ;;  %v765_v1 = vsub.f32 1.0, %v1311_v26 }
 0x1d5   :  { %1039 = vmatprep.mubr.msk.f32.mxu1 %vm45_vm0, %v620_v27 }
 0x1d6   :  { %1040 = vmatmul.mubr.msk.f32.gmra.mxu1 %vm45_vm0, %v621_v28 }
 0x292   :  { %v1038_v29 = vpop.f32.mrf.mxu1 }
 0x293   :  { %741 = vrot.lane.b32.xlu1 %v1038_v29, %s1094_s27 }
 0x294   :  { %v716_v30 = vpop.f32.mrf.mxu1 }
 0x295   :  { %739 = vrot.lane.b32.xlu0 %v716_v30, %s1094_s27 }
 0x296   :  { %v1041_v31 = vpop.f32.mrf.mxu1 }
 0x297   :  { %745 = vrot.lane.b32.xlu1 %v1041_v31, %s1094_s27 }
 0x298   :  { %v726_v32 = vpop.f32.mrf.mxu1 }
 0x299   :  { %743 = vrot.lane.b32.xlu0 %v726_v32, %s1094_s27 }
 0x29b   :  { %769 = vrot.lane.b32.xlu1 %v1262_v48, %s1095_s5 }
 0x29d   :  { %767 = vrot.lane.b32.xlu0 %v1257_v47, %s1095_s5 }
 0x29f   :  { %773 = vrot.lane.b32.xlu1 %v1284_v51, %s1095_s5 }
 0x2a1   :  { %771 = vrot.lane.b32.xlu0 %v1271_v50, %s1095_s5 }
 0x305   :  { %v742_v33 = vpop.permute.xlu1 %741 }
 0x306   :  { %v752_v34 = vadd.f32 %v1288_v56, %v742_v33  ;;  %v763_v56 = vsub.f32 1.0, %v1059_v22 }
 0x307   :  { %v740_v35 = vpop.permute.xlu0 %739 }
 0x308   :  { %v756_v36 = vadd.f32 %v1295_v58, %v752_v34  ;;  %v751_v37 = vadd.f32 %v740_v35, %v1290_v57 }
 0x309   :  { %v746_v38 = vpop.permute.xlu1 %745 }
 0x30a   :  { %1064 = vtanh.f32 %v756_v36  ;;  %v755_v39 = vadd.f32 %v1295_v58, %v751_v37  ;;  %v754_v40 = vadd.f32 %v1298_v61, %v746_v38 }
 0x30b   :  { %v744_v41 = vpop.permute.xlu0 %743 }
 0x30c   :  { %1066 = vtanh.f32 %v755_v39  ;;  %v758_v42 = vadd.f32 %v1295_v58, %v754_v40  ;;  %v753_v43 = vadd.f32 %v744_v41, %v470_v5 }
 0x30d   :  { %v770_v49 = vpop.permute.xlu1 %769 }
 0x30e   :  { %1068 = vtanh.f32 %v758_v42  ;;  %v757_v44 = vadd.f32 %v1295_v58, %v753_v43  ;;  %v780_v55 = vmul.f32 %v770_v49, %v764_v53 }
 0x30f   :  { %v768_v50 = vpop.permute.xlu0 %767 }
 0x310   :  { %1070 = vtanh.f32 %v757_v44  ;;  %v779_v59 = vmul.f32 %v768_v50, %v763_v56 }
 0x311   :  { %v774_v51 = vpop.permute.xlu1 %773 }
 0x312   :  { %v782_v0 = vmul.f32 %v774_v51, %v766_v60 }
 0x313   :  { %v772_v52 = vpop.permute.xlu0 %771 }
 0x314   :  { %v781_v5 = vmul.f32 %v772_v52, %v765_v1 }
 0x317   :  { %v1065_v45 = vpop.eup %1064 }
 0x318   :  { %789 = vrot.lane.b32.xlu1 %v1065_v45, %s1096_s19 }
 0x319   :  { %v1067_v46 = vpop.eup %1066 }
 0x31a   :  { %787 = vrot.lane.b32.xlu0 %v1067_v46, %s1096_s19 }
 0x31b   :  { %v1069_v47 = vpop.eup %1068 }
 0x31c   :  { %793 = vrot.lane.b32.xlu1 %v1069_v47, %s1096_s19 }
 0x31d   :  { %v1071_v48 = vpop.eup %1070 }
 0x31e   :  { %791 = vrot.lane.b32.xlu0 %v1071_v48, %s1096_s19 }
 0x38a   :  { %v790_v54 = vpop.permute.xlu1 %789 }
 0x38b   :  { %v800_v57 = vmul.f32 %v1057_v21, %v790_v54 }
 0x38c   :  { %v788_v58 = vpop.permute.xlu0 %787 }
 0x38d   :  { %v804_v61 = vadd.f32 %v800_v57, %v780_v55  ;;  %v799_v62 = vmul.f32 %v1059_v22, %v788_v58 }
 0x38e   :  { %v794_v63 = vpop.permute.xlu1 %793 }
 0x38f   :  { %v803_v2 = vadd.f32 %v799_v62, %v779_v59  ;;  %v802_v3 = vmul.f32 %v1308_v25, %v794_v63  ;;  %813 = vrot.lane.b32.xlu1 %v804_v61, %s1096_s19 }
 0x390   :  { %v792_v4 = vpop.permute.xlu0 %791 }
 0x391   :  { %v806_v6 = vadd.f32 %v802_v3, %v782_v0  ;;  %v801_v7 = vmul.f32 %v1311_v26, %v792_v4  ;;  %811 = vrot.lane.b32.xlu0 %v803_v2, %s1096_s19 }
 0x393   :  { %v805_v8 = vadd.f32 %v801_v7, %v781_v5  ;;  %817 = vrot.lane.b32.xlu1 %v806_v6, %s1096_s19 }
 0x395   :  { %815 = vrot.lane.b32.xlu0 %v805_v8, %s1096_s19 }
 0x401   :  { %v814_v9 = vpop.permute.xlu1 %813 }
 0x402   :  { %824 = vst.msk [vmem:[#allocation2 + $0x8] sm:$0xff] %vm45_vm0, %v814_v9 }
 0x403   :  { %v812_v10 = vpop.permute.xlu0 %811 }
 0x404   :  { %823 = vst.msk [vmem:[#allocation2] sm:$0xff] %vm45_vm0, %v812_v10 }
 0x405   :  { %v818_v11 = vpop.permute.xlu1 %817 }
 0x406   :  { %826 = vst.msk [vmem:[#allocation2 + $0x18] sm:$0xff] %vm45_vm0, %v818_v11 }
 0x407   :  { %v816_v12 = vpop.permute.xlu0 %815 }
 0x408   :  { %825 = vst.msk [vmem:[#allocation2 + $0x10] sm:$0xff] %vm45_vm0, %v816_v12 }
 0x409   :  { %1083 = shalt.err (!%p1080_p4)
}
 0x40a   :  { %s1098_s2 = smov 128   ;;  %s1099_s23 = smov 8  }
 0x40b   :  { %838 = dma.vmem_to_hbm [thread:$0]  %s833_s21, 512, %s1360_s6, [#allocation3], %s1098_s2, %s1098_s2, %s1099_s23  }
 0x40c   :  { %1092 = dma.done.wait [#allocation3], 512  }
 0x40d   :  { %1093 = vsyncadd [#allocation3], 4294966784 }
 0x40e   :  { %842 = vsyncpa [#allocation3], 1 }

</bundles_post_ra>
